<compile_context>
chip_gen: v7x
topology: tpu7x:2x2x1
jax: 0.10.0
libtpu: 0.0.40
codegen_flags: <defaults>
</compile_context>

<pallas_src>
import functools

import jax
import jax.numpy as jnp
from jax.experimental import pallas as pl
from jax.experimental.pallas import tpu as pltpu

_H = 30          # hidden width
_LANE = 128      # TPU vreg lane width


def _softplus(x):
    # Branchless, overflow-safe softplus.  For x > 20 the log1p term underflows
    # relative to x in f32, matching torch.nn.Softplus(beta=1, threshold=20).
    return jnp.maximum(x, 0.0) + jnp.log1p(jnp.exp(-jnp.abs(x)))


def _mlp_kernel(x_ref, w1_ref, b1_ref, w2_ref, b2_ref, w3_ref, b3_ref, o_ref):
    # Layouts (features-major, batch on the lane axis):
    #   x_ref  : (2,  tm)   batch tile
    #   w1_ref : (30, 2)    torch Linear(2,30).weight  (out, in)
    #   b1_ref : (30, 1)
    #   w2_ref : (30, 30)   torch Linear(30,30).weight (out, in)
    #   b2_ref : (30, 1)
    #   w3_ref : (30, 2)    torch Linear(30,2).weight.T (in, out)
    #   b3_ref : (2,  1)
    #   o_ref  : (2,  tm)
    x = x_ref[...]                                              # (2, tm)
    w1 = w1_ref[...]                                            # (30, 2)

    # Layer 1: K=2 -> two VPU broadcast FMAs, no MXU fill/drain.
    h1 = (w1[:, 0:1] * x[0:1, :]
          + w1[:, 1:2] * x[1:2, :]
          + b1_ref[...])                                        # (30, tm)
    h1 = _softplus(h1)

    # Layer 2: the only real matmul (30x30) -> MXU.
    h2 = jnp.dot(w2_ref[...], h1,
                 preferred_element_type=jnp.float32) + b2_ref[...]  # (30, tm)
    h2 = _softplus(h2)

    # Layer 3: only 2 output rows -> keep off the MXU; VPU mul + sublane reduce.
    w3 = w3_ref[...]                                            # (30, 2)
    b3 = b3_ref[...]                                            # (2, 1)
    o0 = jnp.sum(w3[:, 0:1] * h2, axis=0, keepdims=True) + b3[0:1, :]  # (1, tm)
    o1 = jnp.sum(w3[:, 1:2] * h2, axis=0, keepdims=True) + b3[1:2, :]  # (1, tm)
    o_ref[...] = jnp.concatenate([o0, o1], axis=0)              # (2, tm)


@functools.partial(jax.jit, static_argnames=("tm_max",))
def trajectory_model_forward(x, params, *, tm_max=4096):
    """x: (B, 2) float (PyTorch NC layout).  Returns (B, 2) float32."""
    assert tm_max % _LANE == 0, "batch tile must be a multiple of 128 lanes"
    w1, b1, w2, b2, w3, b3 = (
        params["w1"], params["b1"], params["w2"],
        params["b2"], params["w3"], params["b3"],
    )

    # nn.Flatten() on a (B, 2) input is identity; higher-rank inputs would be
    # reshaped to (B, -1) here (wrapper glue, not the hot path).
    B = x.shape[0]

    # Lane-dense layout: batch on the 128-lane axis (single transpose in the
    # wrapper, XLA glue).
    xt = x.astype(jnp.float32).T                                # (2, B)

    # Pad the batch up to a lane multiple and a tile multiple; slice back after.
    b_pad = max(_LANE, pl.cdiv(B, _LANE) * _LANE)
    tm = min(tm_max, b_pad)          # small batches -> one block
    b_pad = pl.cdiv(b_pad, tm) * tm
    if b_pad != B:
        xt = jnp.pad(xt, ((0, 0), (0, b_pad - B)))

    grid = (b_pad // tm,)
    full = lambda a: pl.BlockSpec(a.shape, lambda i: (0,) * a.ndim)

    flops = 2 * b_pad * (2 * _H + _H * _H + _H * 2)
    transcendentals = 2 * 2 * _H * b_pad           # exp + log1p per hidden unit
    weight_bytes = 4 * (2 * _H + _H + _H * _H + _H + _H * 2 + 2)

    out_t = pl.pallas_call(
        _mlp_kernel,
        out_shape=jax.ShapeDtypeStruct((2, b_pad), jnp.float32),
        grid_spec=pltpu.PrefetchScalarGridSpec(
            num_scalar_prefetch=0,
            grid=grid,
            in_specs=[
                pl.BlockSpec((2, tm), lambda i: (0, i)),   # x batch tile (lane-dense)
                full(w1),                                  # (30, 2)
                full(b1),                                  # (30, 1)
                full(w2),                                  # (30, 30)
                full(b2),                                  # (30, 1)
                full(w3),                                  # (30, 2)
                full(b3),                                  # (2, 1)
            ],
            out_specs=pl.BlockSpec((2, tm), lambda i: (0, i)),
        ),
        compiler_params=pltpu.CompilerParams(
            # "parallel" lets multi-step grids shard across v7x's two TensorCores.
            dimension_semantics=("parallel",),
        ),
        cost_estimate=pl.CostEstimate(
            flops=flops,
            transcendentals=transcendentals,
            bytes_accessed=16 * b_pad + weight_bytes,
        ),
    )(xt, w1, b1, w2, b2, w3, b3)

    return out_t[:, :B].T                                       # (B, 2)


def init_params(key):
    """Deterministic init matching the PyTorch layer shapes.

    Stored layouts (kernel-friendly, features-major / batch-on-lanes):
      w1 (30, 2)  = torch Linear(2,30).weight   (out, in)
      b1 (30, 1)
      w2 (30, 30) = torch Linear(30,30).weight  (out, in)
      b2 (30, 1)
      w3 (30, 2)  = torch Linear(30,2).weight.T (in, out)
      b3 (2, 1)
    Uniform(-1/sqrt(fan_in), 1/sqrt(fan_in)) like nn.Linear's default init.
    """
    ks = jax.random.split(key, 6)

    def uinit(k, shape, fan_in):
        bound = 1.0 / jnp.sqrt(fan_in)
        return jax.random.uniform(k, shape, jnp.float32, -bound, bound)

    return {
        "w1": uinit(ks[0], (_H, 2), 2.0),
        "b1": uinit(ks[1], (_H, 1), 2.0),
        "w2": uinit(ks[2], (_H, _H), 30.0),
        "b2": uinit(ks[3], (_H, 1), 30.0),
        "w3": uinit(ks[4], (_H, 2), 30.0),
        "b3": uinit(ks[5], (2, 1), 30.0),
    }


def _reference_forward(x, params):
    """Pure-JAX reference (NC layout) for correctness checking."""
    x = x.astype(jnp.float32)
    h = jnp.logaddexp(x @ params["w1"].T + params["b1"].T, 0.0)   # (B, 30)
    h = jnp.logaddexp(h @ params["w2"].T + params["b2"].T, 0.0)   # (B, 30)
    return h @ params["w3"] + params["b3"].T                      # (B, 2)


if __name__ == "__main__":
    key = jax.random.PRNGKey(0)
    pkey, xkey = jax.random.split(key)

    params = init_params(pkey)
    x = jax.random.normal(xkey, (8, 2), jnp.float32)  # batch=8, features=2

    out = trajectory_model_forward(x, params)
    out = jax.block_until_ready(out)

    ref = _reference_forward(x, params)
    assert out.shape == (8, 2)
    assert jnp.allclose(out, ref, atol=1e-5, rtol=1e-5), "mismatch vs reference"

    # Also exercise a non-tile-multiple, multi-block batch to cover padding
    # and the multi-step parallel grid path.
    x_big = jax.random.normal(xkey, (5000, 2), jnp.float32)
    out_big = jax.block_until_ready(
        trajectory_model_forward(x_big, params, tm_max=2048))
    ref_big = _reference_forward(x_big, params)
    assert out_big.shape == (5000, 2)
    assert jnp.allclose(out_big, ref_big, atol=1e-4, rtol=1e-4), "big-batch mismatch"

    print("KERNEL_OK")
</pallas_src>

<mosaic_0001>
module attributes {stable_mosaic.version = 11 : i64} {
  func.func @_mlp_kernel(%arg0: i32, %arg1: memref<2x128xf32, #tpu.memory_space<vmem>>, %arg2: memref<30x2xf32, #tpu.memory_space<vmem>>, %arg3: memref<30x1xf32, #tpu.memory_space<vmem>>, %arg4: memref<30x30xf32, #tpu.memory_space<vmem>>, %arg5: memref<30x1xf32, #tpu.memory_space<vmem>>, %arg6: memref<30x2xf32, #tpu.memory_space<vmem>>, %arg7: memref<2x1xf32, #tpu.memory_space<vmem>>, %arg8: memref<2x128xf32, #tpu.memory_space<vmem>>) attributes {dimension_semantics = [#tpu.dimension_semantics<parallel>], iteration_bounds = array<i64: 1>, scalar_prefetch = 0 : i64, scratch_operands = 0 : i64, tpu.core_type = #tpu.core_type<tc>, window_params = [{transform_indices = @transform_0, window_bounds = array<i64: 2, 128>}, {pipeline_mode = #tpu.pipeline_mode<synchronous>, transform_indices = @transform_1, window_bounds = array<i64: 30, 2>}, {pipeline_mode = #tpu.pipeline_mode<synchronous>, transform_indices = @transform_2, window_bounds = array<i64: 30, 1>}, {pipeline_mode = #tpu.pipeline_mode<synchronous>, transform_indices = @transform_3, window_bounds = array<i64: 30, 30>}, {pipeline_mode = #tpu.pipeline_mode<synchronous>, transform_indices = @transform_4, window_bounds = array<i64: 30, 1>}, {pipeline_mode = #tpu.pipeline_mode<synchronous>, transform_indices = @transform_5, window_bounds = array<i64: 30, 2>}, {pipeline_mode = #tpu.pipeline_mode<synchronous>, transform_indices = @transform_6, window_bounds = array<i64: 2, 1>}, {transform_indices = @transform_7, window_bounds = array<i64: 2, 128>}]} {
    %c0 = arith.constant 0 : index
    %c0_0 = arith.constant 0 : index
    %0 = vector.load %arg1[%c0, %c0_0] : memref<2x128xf32, #tpu.memory_space<vmem>>, vector<2x128xf32>
    %c0_1 = arith.constant 0 : index
    %c0_2 = arith.constant 0 : index
    %1 = vector.load %arg2[%c0_1, %c0_2] : memref<30x2xf32, #tpu.memory_space<vmem>>, vector<30x2xf32>
    %2 = vector.extract_strided_slice %1 {offsets = [0, 0], sizes = [30, 1], strides = [1, 1]} : vector<30x2xf32> to vector<30x1xf32>
    %3 = vector.extract_strided_slice %0 {offsets = [0, 0], sizes = [1, 128], strides = [1, 1]} : vector<2x128xf32> to vector<1x128xf32>
    %4 = vector.broadcast %2 : vector<30x1xf32> to vector<30x128xf32>
    %5 = vector.broadcast %3 : vector<1x128xf32> to vector<30x128xf32>
    %6 = arith.mulf %4, %5 : vector<30x128xf32>
    %7 = vector.extract_strided_slice %1 {offsets = [0, 1], sizes = [30, 1], strides = [1, 1]} : vector<30x2xf32> to vector<30x1xf32>
    %8 = vector.extract_strided_slice %0 {offsets = [1, 0], sizes = [1, 128], strides = [1, 1]} : vector<2x128xf32> to vector<1x128xf32>
    %9 = vector.broadcast %7 : vector<30x1xf32> to vector<30x128xf32>
    %10 = vector.broadcast %8 : vector<1x128xf32> to vector<30x128xf32>
    %11 = arith.mulf %9, %10 : vector<30x128xf32>
    %12 = arith.addf %6, %11 : vector<30x128xf32>
    %c0_3 = arith.constant 0 : index
    %c0_4 = arith.constant 0 : index
    %13 = vector.load %arg3[%c0_3, %c0_4] : memref<30x1xf32, #tpu.memory_space<vmem>>, vector<30x1xf32>
    %14 = vector.broadcast %13 : vector<30x1xf32> to vector<30x128xf32>
    %15 = arith.addf %12, %14 : vector<30x128xf32>
    %cst = arith.constant 0.000000e+00 : f32
    %16 = vector.broadcast %cst : f32 to vector<30x128xf32>
    %17 = arith.maximumf %15, %16 : vector<30x128xf32>
    %18 = math.absf %15 : vector<30x128xf32>
    %cst_5 = arith.constant 0.000000e+00 : f32
    %19 = vector.broadcast %cst_5 : f32 to vector<30x128xf32>
    %20 = arith.subf %19, %18 : vector<30x128xf32>
    %21 = math.exp %20 : vector<30x128xf32>
    %22 = math.log1p %21 : vector<30x128xf32>
    %23 = arith.addf %17, %22 : vector<30x128xf32>
    %c0_6 = arith.constant 0 : index
    %c0_7 = arith.constant 0 : index
    %24 = vector.load %arg4[%c0_6, %c0_7] : memref<30x30xf32, #tpu.memory_space<vmem>>, vector<30x30xf32>
    %cst_8 = arith.constant dense<0.000000e+00> : vector<30x128xf32>
    %25 = tpu.matmul %24, %23, %cst_8 {dimension_numbers = #tpu.dot_dimension_numbers<[1], [0], [0], [1], [0, 0, 1, 1], [], []>} : vector<30x30xf32>, vector<30x128xf32>, vector<30x128xf32> -> vector<30x128xf32>
    %c0_9 = arith.constant 0 : index
    %c0_10 = arith.constant 0 : index
    %26 = vector.load %arg5[%c0_9, %c0_10] : memref<30x1xf32, #tpu.memory_space<vmem>>, vector<30x1xf32>
    %27 = vector.broadcast %26 : vector<30x1xf32> to vector<30x128xf32>
    %28 = arith.addf %25, %27 : vector<30x128xf32>
    %cst_11 = arith.constant 0.000000e+00 : f32
    %29 = vector.broadcast %cst_11 : f32 to vector<30x128xf32>
    %30 = arith.maximumf %28, %29 : vector<30x128xf32>
    %31 = math.absf %28 : vector<30x128xf32>
    %cst_12 = arith.constant 0.000000e+00 : f32
    %32 = vector.broadcast %cst_12 : f32 to vector<30x128xf32>
    %33 = arith.subf %32, %31 : vector<30x128xf32>
    %34 = math.exp %33 : vector<30x128xf32>
    %35 = math.log1p %34 : vector<30x128xf32>
    %36 = arith.addf %30, %35 : vector<30x128xf32>
    %c0_13 = arith.constant 0 : index
    %c0_14 = arith.constant 0 : index
    %37 = vector.load %arg6[%c0_13, %c0_14] : memref<30x2xf32, #tpu.memory_space<vmem>>, vector<30x2xf32>
    %c0_15 = arith.constant 0 : index
    %c0_16 = arith.constant 0 : index
    %38 = vector.load %arg7[%c0_15, %c0_16] : memref<2x1xf32, #tpu.memory_space<vmem>>, vector<2x1xf32>
    %39 = vector.extract_strided_slice %37 {offsets = [0, 0], sizes = [30, 1], strides = [1, 1]} : vector<30x2xf32> to vector<30x1xf32>
    %40 = vector.broadcast %39 : vector<30x1xf32> to vector<30x128xf32>
    %41 = arith.mulf %40, %36 : vector<30x128xf32>
    %cst_17 = arith.constant dense<0.000000e+00> : vector<128xf32>
    %42 = vector.multi_reduction <add>, %41, %cst_17 [0] : vector<30x128xf32> to vector<128xf32>
    %43 = vector.shape_cast %42 : vector<128xf32> to vector<1x128xf32>
    %44 = vector.extract_strided_slice %38 {offsets = [0, 0], sizes = [1, 1], strides = [1, 1]} : vector<2x1xf32> to vector<1x1xf32>
    %45 = vector.broadcast %44 : vector<1x1xf32> to vector<1x128xf32>
    %46 = arith.addf %43, %45 : vector<1x128xf32>
    %47 = vector.extract_strided_slice %37 {offsets = [0, 1], sizes = [30, 1], strides = [1, 1]} : vector<30x2xf32> to vector<30x1xf32>
    %48 = vector.broadcast %47 : vector<30x1xf32> to vector<30x128xf32>
    %49 = arith.mulf %48, %36 : vector<30x128xf32>
    %cst_18 = arith.constant dense<0.000000e+00> : vector<128xf32>
    %50 = vector.multi_reduction <add>, %49, %cst_18 [0] : vector<30x128xf32> to vector<128xf32>
    %51 = vector.shape_cast %50 : vector<128xf32> to vector<1x128xf32>
    %52 = vector.extract_strided_slice %38 {offsets = [1, 0], sizes = [1, 1], strides = [1, 1]} : vector<2x1xf32> to vector<1x1xf32>
    %53 = vector.broadcast %52 : vector<1x1xf32> to vector<1x128xf32>
    %54 = arith.addf %51, %53 : vector<1x128xf32>
    %55 = tpu.concatenate %46, %54 in 0 : vector<1x128xf32>, vector<1x128xf32> -> vector<2x128xf32>
    %c0_19 = arith.constant 0 : index
    %c0_20 = arith.constant 0 : index
    %56 = vector.load %arg8[%c0_19, %c0_20] : memref<2x128xf32, #tpu.memory_space<vmem>>, vector<2x128xf32>
    tpu.vector_store %arg8[%c0_19, %c0_20], %55 {strides = array<i32>} : memref<2x128xf32, #tpu.memory_space<vmem>>, vector<2x128xf32>,
    return
  }
  func.func @transform_0(%arg0: i32) -> (i32, i32) {
    %c0_i32 = arith.constant 0 : i32
    %c0_i32_0 = arith.constant 0 : i32
    return %c0_i32, %arg0 : i32, i32
  }
  func.func @transform_1(%arg0: i32) -> (i32, i32) {
    %c0_i32 = arith.constant 0 : i32
    %c0_i32_0 = arith.constant 0 : i32
    %c0_i32_1 = arith.constant 0 : i32
    return %c0_i32, %c0_i32_0 : i32, i32
  }
  func.func @transform_2(%arg0: i32) -> (i32, i32) {
    %c0_i32 = arith.constant 0 : i32
    %c0_i32_0 = arith.constant 0 : i32
    %c0_i32_1 = arith.constant 0 : i32
    return %c0_i32, %c0_i32_0 : i32, i32
  }
  func.func @transform_3(%arg0: i32) -> (i32, i32) {
    %c0_i32 = arith.constant 0 : i32
    %c0_i32_0 = arith.constant 0 : i32
    %c0_i32_1 = arith.constant 0 : i32
    return %c0_i32, %c0_i32_0 : i32, i32
  }
  func.func @transform_4(%arg0: i32) -> (i32, i32) {
    %c0_i32 = arith.constant 0 : i32
    %c0_i32_0 = arith.constant 0 : i32
    %c0_i32_1 = arith.constant 0 : i32
    return %c0_i32, %c0_i32_0 : i32, i32
  }
  func.func @transform_5(%arg0: i32) -> (i32, i32) {
    %c0_i32 = arith.constant 0 : i32
    %c0_i32_0 = arith.constant 0 : i32
    %c0_i32_1 = arith.constant 0 : i32
    return %c0_i32, %c0_i32_0 : i32, i32
  }
  func.func @transform_6(%arg0: i32) -> (i32, i32) {
    %c0_i32 = arith.constant 0 : i32
    %c0_i32_0 = arith.constant 0 : i32
    %c0_i32_1 = arith.constant 0 : i32
    return %c0_i32, %c0_i32_0 : i32, i32
  }
  func.func @transform_7(%arg0: i32) -> (i32, i32) {
    %c0_i32 = arith.constant 0 : i32
    %c0_i32_0 = arith.constant 0 : i32
    return %c0_i32, %arg0 : i32, i32
  }
}

</mosaic_0001>

<bundles_post_ra>
// kernel: trajectory_model_forward.1
= control target key start
LH: loop header
LB: loop body
LE: loop exit
PB: predicated region body
PF: predicated region fallthrough
CT: control target
= control target key end

     0   :  { %v533_v0 = vmov 1   ;;  %v534_v4 = vmov 0   ;;  %vm203_vm0 = vcmask 244736   ;;  %v51_v21 = vlaneseq  ;;  %s680_s1 = inlined_call_operand.vmem [shape: f32[30,2], index: 1, kind: input, shape index: {}]   ;;  %s681_s2 = inlined_call_operand.vmem [shape: f32[30,1], index: 2, kind: input, shape index: {}]   ;;  %s682_s4 = inlined_call_operand.vmem [shape: f32[30,1], index: 4, kind: input, shape index: {}]   ;;  %s683_s5 = inlined_call_operand.vmem [shape: f32[30,2], index: 5, kind: input, shape index: {}]   ;;  %s684_s3 = inlined_call_operand.vmem [shape: f32[30,30], index: 3, kind: input, shape index: {}]   ;;  %s685_s6 = inlined_call_operand.vmem [shape: f32[2,1], index: 6, kind: input, shape index: {}]   ;;  %s686_s0 = inlined_call_operand.vmem [shape: f32[2,128], index: 0, kind: input, shape index: {}]   ;;  %s687_s7 = inlined_call_operand.vmem [shape: f32[2,128], index: 7, kind: output, shape index: {}]  }
   0x1   :  { %494 = vset.pattern.permute.xlu0 %v533_v0  ;;  %492 = vset.pattern.permute.xlu1 %v533_v0  ;;  %v29_v1 = vld [vmem:[%s680_s1 + $0x10] sm:$0xff]  ;;  %v27_v2 = vld [vmem:[%s680_s1] sm:$0xff]  ;;  %v28_v3 = vld [vmem:[%s680_s1 + $0x8] sm:$0xff]  ;;  %vm216_vm4 = vcmask 1045504   ;;  %vm535_vm6 = vmmov 1   ;;  %vm441_vm12 = vcmask 1040384  }
   0x2   :  { %68 = vperm.xlu0 %494, %v29_v1   ;;  %60 = vperm.xlu1 %492, %v27_v2   ;;  %v30_v5 = vld [vmem:[%s680_s1 + $0x18] sm:$0x3f]  ;;  %v88_v6 = vld [vmem:[%s681_s2 + $0x8] sm:$0xff]  ;;  %v87_v7 = vld [vmem:[%s681_s2] sm:$0xff]  ;;  %v52_v24 = vshrl.u32 %v51_v21, 7 }
   0x3   :  { %v179_v8 = vld [vmem:[%s682_s4] sm:$0xff]  ;;  %v89_v9 = vld [vmem:[%s681_s2 + $0x10] sm:$0xff]  ;;  %v90_v11 = vld [vmem:[%s681_s2 + $0x18] sm:$0x3f] }
   0x4   :  { %v181_v10 = vld [vmem:[%s682_s4 + $0x10] sm:$0xff]  ;;  %v365_v12 = vld [vmem:[%s683_s5] sm:$0xff]  ;;  %v180_v13 = vld [vmem:[%s682_s4 + $0x8] sm:$0xff]  ;;  %v53_v27 = vsub.s32 0, %v52_v24  ;;  %v77_v28 = vsub.s32 1, %v52_v24 }
   0x5   :  { %v182_v14 = vld [vmem:[%s682_s4 + $0x18] sm:$0x3f]  ;;  %v366_v15 = vld [vmem:[%s683_s5 + $0x8] sm:$0xff]  ;;  %v175_v16 = vld [vmem:[%s684_s3] sm:$0xff] }
   0x6   :  { %495 = vset.pattern.permute.xlu0 %v534_v4  ;;  %64 = vperm.xlu1 %492, %v28_v3   ;;  %v177_v17 = vld [vmem:[%s684_s3 + $0x10] sm:$0xff]  ;;  %v368_v19 = vld [vmem:[%s683_s5 + $0x18] sm:$0x3f]  ;;  %v369_v20 = vld [vmem:[%s685_s6] sm:$0x3] }
   0x7   :  { %33 = vperm.xlu0 %495, %v27_v2   ;;  %469 = vmatprep.mubr.msk.f32.mxu0 %vm203_vm0, %v175_v16  ;;  %v367_v18 = vld [vmem:[%s683_s5 + $0x10] sm:$0xff]  ;;  %v26_v29 = vld [vmem:[%s686_s0] sm:$0x3]  ;;  %vm480_vm7 = vmpackc.low %vm216_vm4, %vm535_vm6 }
   0x8   :  { %472 = vmatprep.mubr.msk.f32.mxu1 %vm203_vm0, %v177_v17  ;;  %v54_v32 = vrot.slane %v26_v29, %v53_v27  ;;  %v78_v33 = vrot.slane %v26_v29, %v77_v28 }
   0xa   :  { %493 = vset.pattern.permute.xlu1 %v534_v4 }
   0xb   :  { %38 = vperm.xlu0 %495, %v28_v3   ;;  %48 = vperm.xlu1 %493, %v30_v5  }
   0xf   :  { %43 = vperm.xlu0 %495, %v29_v1   ;;  %496 = vset.pattern.permute.xlu1 %v533_v0 }
  0x10   :  { %72 = vperm.xlu1 %496, %v30_v5  }
  0x13   :  { %98 = vperm.xlu0 %495, %v88_v6  }
  0x14   :  { %497 = vset.pattern.permute.xlu1 %v534_v4 }
  0x15   :  { %93 = vperm.xlu1 %497, %v87_v7  }
  0x17   :  { %185 = vperm.xlu0 %495, %v179_v8  }
  0x19   :  { %103 = vperm.xlu1 %497, %v89_v9  }
  0x1b   :  { %195 = vperm.xlu0 %495, %v181_v10  }
  0x1d   :  { %108 = vperm.xlu1 %497, %v90_v11  }
  0x1f   :  { %372 = vperm.xlu0 %495, %v365_v12  }
  0x21   :  { %190 = vperm.xlu1 %497, %v180_v13  }
  0x23   :  { %498 = vset.pattern.permute.xlu0 %v533_v0 }
  0x24   :  { %411 = vperm.xlu0 %498, %v365_v12  }
  0x25   :  { %200 = vperm.xlu1 %497, %v182_v14  }
  0x28   :  { %419 = vperm.xlu0 %498, %v367_v18  }
  0x29   :  { %377 = vperm.xlu1 %497, %v366_v15  }
  0x2c   :  { %423 = vperm.xlu0 %498, %v368_v19  }
  0x2d   :  { %499 = vset.pattern.permute.xlu1 %v533_v0 }
  0x2e   :  { %415 = vperm.xlu1 %499, %v366_v15  }
  0x32   :  { %500 = vset.pattern.permute.xlu1 %v534_v4 }
  0x33   :  { %382 = vperm.xlu1 %500, %v367_v18  }
  0x37   :  { %387 = vperm.xlu1 %500, %v368_v19  }
  0x3b   :  { %406 = vperm.xlu1 %500, %v369_v20  }
  0x81   :  { %v61_v22 = vpop.permute.xlu1 %60  ;;  %v69_v23 = vpop.permute.xlu0 %68 }
  0x82   :  { %v79_v39 = vmul.f32 %v78_v33, %v61_v22  ;;  %v81_v46 = vmul.f32 %v78_v33, %v69_v23 }
  0x85   :  { %v65_v25 = vpop.permute.xlu1 %64 }
  0x86   :  { %v34_v26 = vpop.permute.xlu0 %33  ;;  %v80_v36 = vmul.f32 %v78_v33, %v65_v25 }
  0x87   :  { %v55_v37 = vmul.f32 %v54_v32, %v34_v26 }
  0x89   :  { %v83_v44 = vadd.f32 %v79_v39, %v55_v37 }
  0x8a   :  { %v39_v30 = vpop.permute.xlu0 %38  ;;  %v49_v31 = vpop.permute.xlu1 %48 }
  0x8b   :  { %v56_v34 = vmul.f32 %v54_v32, %v39_v30  ;;  %v58_v54 = vmul.f32 %v54_v32, %v49_v31 }
  0x8d   :  { %v84_v40 = vadd.f32 %v80_v36, %v56_v34 }
  0x8e   :  { %v44_v35 = vpop.permute.xlu0 %43 }
  0x8f   :  { %v73_v38 = vpop.permute.xlu1 %72  ;;  %v57_v42 = vmul.f32 %v54_v32, %v44_v35 }
  0x90   :  { %v82_v49 = vmul.f32 %v78_v33, %v73_v38 }
  0x91   :  { %v85_v52 = vadd.f32 %v81_v46, %v57_v42 }
  0x92   :  { %v99_v41 = vpop.permute.xlu0 %98  ;;  %v86_v60 = vadd.f32 %v82_v49, %v58_v54 }
  0x93   :  { %v638_v43 = vadd.f32 %v99_v41, %v84_v40 }
  0x94   :  { %v94_v45 = vpop.permute.xlu1 %93 }
  0x95   :  { %v120_v47 = vand.u32 2147483647, %v638_v43  ;;  %v111_v48 = vadd.f32 %v94_v45, %v83_v44  ;;  %v116_v27 = vmax.f32 %v638_v43, 0.0 }
  0x97   :  { %v124_v50 = vsub.f32 0.0, %v120_v47  ;;  %v119_v51 = vand.u32 2147483647, %v111_v48  ;;  %v115_v28 = vmax.f32 %v111_v48, 0.0 }
  0x98   :  { %v104_v53 = vpop.permute.xlu1 %103 }
  0x99   :  { %v129_v55 = vmul.f32 1.442695, %v124_v50  ;;  %v123_v56 = vsub.f32 0.0, %v119_v51  ;;  %v641_v57 = vadd.f32 %v104_v53, %v85_v52  ;;  %v176_v50 = vld [vmem:[%s684_s3 + $0x8] sm:$0xff]  ;;  %v178_v51 = vld [vmem:[%s684_s3 + $0x18] sm:$0x3f]  ;;  %v186_v52 = vpop.permute.xlu0 %185 }
  0x9b   :  { %501 = vpow2.f32 %v129_v55  ;;  %v127_v58 = vmul.f32 1.442695, %v123_v56  ;;  %v121_v59 = vand.u32 2147483647, %v641_v57  ;;  %v117_v44 = vmax.f32 %v641_v57, 0.0 }
  0x9c   :  { %v109_v61 = vpop.permute.xlu1 %108 }
  0x9d   :  { %503 = vpow2.f32 %v127_v58  ;;  %v125_v62 = vsub.f32 0.0, %v121_v59  ;;  %v644_v63 = vadd.f32 %v109_v61, %v86_v60  ;;  %v196_v54 = vpop.permute.xlu0 %195 }
  0x9f   :  { %v131_v0 = vmul.f32 1.442695, %v125_v62  ;;  %v122_v1 = vand.u32 2147483647, %v644_v63  ;;  %v118_v45 = vmax.f32 %v644_v63, 0.0 }
  0xa0   :  { %v191_v53 = vpop.permute.xlu1 %190 }
  0xa1   :  { %505 = vpow2.f32 %v131_v0  ;;  %v126_v2 = vsub.f32 0.0, %v122_v1 }
  0xa3   :  { %v133_v3 = vmul.f32 1.442695, %v126_v2 }
  0xa4   :  { %v201_v55 = vpop.permute.xlu1 %200 }
  0xa5   :  { %v502_v4 = vpop.eup %501  ;;  %507 = vpow2.f32 %v133_v3 }
  0xa6   :  { %v144_v5 = vadd.f32 1.0, %v502_v4  ;;  %v147_v9 = vmul.f32 -0.5, %v502_v4  ;;  %v150_v14 = vand.u32 2147483647, %v502_v4 }
  0xa7   :  { %v504_v6 = vpop.eup %503 }
  0xa8   :  { %509 = vlog2.f32 %v144_v5  ;;  %v135_v7 = vadd.f32 1.0, %v504_v6  ;;  %v138_v11 = vmul.f32 -0.5, %v504_v6  ;;  %v148_v13 = vadd.f32 1.0, %v147_v9 }
  0xa9   :  { %v141_v18 = vand.u32 2147483647, %v504_v6  ;;  %vm151_vm1 = vcmp.lt.f32.partialorder %v150_v14, 0.0004427343 }
  0xaa   :  { %511 = vlog2.f32 %v135_v7  ;;  %v139_v16 = vadd.f32 1.0, %v138_v11  ;;  %v149_v20 = vmul.f32 %v502_v4, %v148_v13 }
  0xab   :  { %v506_v8 = vpop.eup %505  ;;  %vm142_vm2 = vcmp.lt.f32.partialorder %v141_v18, 0.0004427343 }
  0xac   :  { %v153_v10 = vadd.f32 1.0, %v506_v8  ;;  %v156_v21 = vmul.f32 -0.5, %v506_v8  ;;  %v140_v25 = vmul.f32 %v504_v6, %v139_v16  ;;  %v159_v34 = vand.u32 2147483647, %v506_v8 }
  0xae   :  { %513 = vlog2.f32 %v153_v10  ;;  %v157_v30 = vadd.f32 1.0, %v156_v21  ;;  %vm160_vm3 = vcmp.lt.f32.partialorder %v159_v34, 0.0004427343  ;;  %v378_v21 = vpop.permute.xlu1 %377 }
  0xaf   :  { %v508_v12 = vpop.eup %507 }
  0xb0   :  { %v162_v15 = vadd.f32 1.0, %v508_v12  ;;  %v165_v26 = vmul.f32 -0.5, %v508_v12  ;;  %v168_v38 = vand.u32 2147483647, %v508_v12  ;;  %v158_v39 = vmul.f32 %v506_v8, %v157_v30 }
  0xb2   :  { %v510_v17 = vpop.eup %509  ;;  %515 = vlog2.f32 %v162_v15  ;;  %v166_v36 = vadd.f32 1.0, %v165_v26  ;;  %vm169_vm5 = vcmp.lt.f32.partialorder %v168_v38, 0.0004427343  ;;  %v416_v26 = vpop.permute.xlu1 %415 }
  0xb3   :  { %v146_v19 = vmul.f32 0.6931472, %v510_v17 }
  0xb4   :  { %v512_v22 = vpop.eup %511  ;;  %v167_v43 = vmul.f32 %v508_v12, %v166_v36 }
  0xb5   :  { %v152_v23 = vsel %vm151_vm1, %v149_v20, %v146_v19  ;;  %v137_v24 = vmul.f32 0.6931472, %v512_v22  ;;  %v373_v20 = vpop.permute.xlu0 %372 }
  0xb6   :  { %v172_v32 = vadd.f32 %v152_v23, %v116_v27 }
  0xb7   :  { %v143_v29 = vsel %vm142_vm2, %v140_v25, %v137_v24 }
  0xb8   :  { %v514_v31 = vpop.eup %513  ;;  %v171_v33 = vadd.f32 %v143_v29, %v115_v28 }
  0xb9   :  { %v155_v35 = vmul.f32 0.6931472, %v514_v31  ;;  %v412_v25 = vpop.permute.xlu0 %411 }
  0xba   :  { %v475_v37 = vpack.c.bf16 %v172_v32, %v171_v33 }
  0xbb   :  { %v161_v41 = vsel %vm160_vm3, %v158_v39, %v155_v35 }
  0xbc   :  { %v516_v40 = vpop.eup %515  ;;  %476 = vmatprep.subr.bf16.mxu0 %v475_v37  ;;  %485 = vmatprep.subr.bf16.mxu1 %v475_v37  ;;  %v173_v47 = vadd.f32 %v161_v41, %v117_v44 }
  0xbd   :  { %v164_v42 = vmul.f32 0.6931472, %v516_v40  ;;  %478 = vmatpush3.bf16.msra.mxu0 %v475_v37  ;;  %487 = vmatpush3.bf16.msra.mxu1 %v475_v37 }
  0xbf   :  { %v170_v46 = vsel %vm169_vm5, %v167_v43, %v164_v42 }
  0xc0   :  { %v174_v48 = vadd.f32 %v170_v46, %v118_v45 }
  0xc2   :  { %v479_v49 = vpack.c.bf16 %v174_v48, %v173_v47  ;;  %v420_v48 = vpop.permute.xlu0 %419 }
  0xc4   :  { %481 = vmatprep.subr.msk.bf16.mxu0 %vm480_vm7, %v479_v49  ;;  %486 = vmatprep.subr.msk.bf16.mxu1 %vm480_vm7, %v479_v49 }
  0xc5   :  { %484 = vmatpush3.bf16.msk.msra.mxu0 %vm480_vm7, %v479_v49  ;;  %488 = vmatpush3.bf16.msk.msra.mxu1 %vm480_vm7, %v479_v49  ;;  %v383_v49 = vpop.permute.xlu1 %382 }
  0xc8   :  { %470 = vmatmul.mubr.msk.f32.vlgmr.msra.gmra.mrb[0].mxu0 %vm203_vm0, %v176_v50  ;;  %473 = vmatmul.mubr.msk.f32.vlgmr.msra.gmra.mrb[0].mxu1 %vm203_vm0, %v178_v51 }
 0x19b   :  { %v471_v56 = vpop.f32.mrb[0].mxu0  ;;  %v474_v57 = vpop.f32.mrb[0].mxu1 }
 0x19c   :  { %v659_v58 = vadd.f32 %v471_v56, %v191_v53  ;;  %v661_v59 = vadd.f32 %v474_v57, %v201_v55  ;;  %v286_v60 = vpop.f32.mrb[1].mxu0  ;;  %v296_v61 = vpop.f32.mrb[1].mxu1 }
 0x19d   :  { %v663_v62 = vadd.f32 %v286_v60, %v186_v52  ;;  %v665_v63 = vadd.f32 %v296_v61, %v196_v54 }
 0x19e   :  { %v310_v0 = vand.u32 2147483647, %v659_v58  ;;  %v312_v1 = vand.u32 2147483647, %v661_v59  ;;  %v306_v33 = vmax.f32 %v659_v58, 0.0  ;;  %v308_v41 = vmax.f32 %v661_v59, 0.0 }
 0x19f   :  { %v309_v2 = vand.u32 2147483647, %v663_v62  ;;  %v311_v3 = vand.u32 2147483647, %v665_v63  ;;  %v305_v42 = vmax.f32 %v663_v62, 0.0  ;;  %v307_v43 = vmax.f32 %v665_v63, 0.0 }
 0x1a0   :  { %v314_v4 = vsub.f32 0.0, %v310_v0  ;;  %v316_v5 = vsub.f32 0.0, %v312_v1 }
 0x1a1   :  { %v313_v6 = vsub.f32 0.0, %v309_v2  ;;  %v315_v7 = vsub.f32 0.0, %v311_v3 }
 0x1a2   :  { %v319_v8 = vmul.f32 1.442695, %v314_v4  ;;  %v323_v9 = vmul.f32 1.442695, %v316_v5  ;;  %v424_v4 = vpop.permute.xlu0 %423  ;;  %v388_v5 = vpop.permute.xlu1 %387 }
 0x1a3   :  { %v317_v10 = vmul.f32 1.442695, %v313_v6  ;;  %v321_v11 = vmul.f32 1.442695, %v315_v7 }
 0x1a4   :  { %517 = vpow2.f32 %v319_v8 }
 0x1a5   :  { %519 = vpow2.f32 %v323_v9 }
 0x1a6   :  { %521 = vpow2.f32 %v317_v10 }
 0x1a7   :  { %523 = vpow2.f32 %v321_v11 }
 0x1ae   :  { %v518_v12 = vpop.eup %517 }
 0x1af   :  { %v520_v13 = vpop.eup %519  ;;  %v334_v14 = vadd.f32 1.0, %v518_v12  ;;  %v337_v22 = vmul.f32 -0.5, %v518_v12  ;;  %v340_v29 = vand.u32 2147483647, %v518_v12 }
 0x1b0   :  { %v522_v15 = vpop.eup %521  ;;  %v352_v18 = vadd.f32 1.0, %v520_v13  ;;  %v355_v28 = vmul.f32 -0.5, %v520_v13  ;;  %v358_v39 = vand.u32 2147483647, %v520_v13 }
 0x1b1   :  { %v524_v16 = vpop.eup %523  ;;  %v325_v17 = vadd.f32 1.0, %v522_v15  ;;  %525 = vlog2.f32 %v334_v14  ;;  %v328_v23 = vmul.f32 -0.5, %v522_v15  ;;  %v338_v27 = vadd.f32 1.0, %v337_v22 }
 0x1b2   :  { %v343_v19 = vadd.f32 1.0, %v524_v16  ;;  %v346_v24 = vmul.f32 -0.5, %v524_v16  ;;  %v331_v31 = vand.u32 2147483647, %v522_v15  ;;  %v349_v35 = vand.u32 2147483647, %v524_v16 }
 0x1b3   :  { %527 = vlog2.f32 %v325_v17  ;;  %v329_v30 = vadd.f32 1.0, %v328_v23  ;;  %v339_v37 = vmul.f32 %v518_v12, %v338_v27  ;;  %v356_v38 = vadd.f32 1.0, %v355_v28  ;;  %v407_v28 = vpop.permute.xlu1 %406 }
 0x1b4   :  { %529 = vlog2.f32 %v343_v19  ;;  %v347_v34 = vadd.f32 1.0, %v346_v24  ;;  %vm341_vm8 = vcmp.lt.f32.partialorder %v340_v29, 0.0004427343  ;;  %vm332_vm9 = vcmp.lt.f32.partialorder %v331_v31, 0.0004427343 }
 0x1b5   :  { %531 = vlog2.f32 %v352_v18  ;;  %v330_v46 = vmul.f32 %v522_v15, %v329_v30  ;;  %vm350_vm10 = vcmp.lt.f32.partialorder %v349_v35, 0.0004427343  ;;  %v357_v56 = vmul.f32 %v520_v13, %v356_v38 }
 0x1b6   :  { %v348_v53 = vmul.f32 %v524_v16, %v347_v34  ;;  %vm359_vm11 = vcmp.lt.f32.partialorder %v358_v39, 0.0004427343 }
 0x1bb   :  { %v526_v32 = vpop.eup %525 }
 0x1bc   :  { %v336_v36 = vmul.f32 0.6931472, %v526_v32 }
 0x1bd   :  { %v528_v40 = vpop.eup %527 }
 0x1be   :  { %v530_v44 = vpop.eup %529  ;;  %v327_v45 = vmul.f32 0.6931472, %v528_v40  ;;  %v342_v47 = vsel %vm341_vm8, %v339_v37, %v336_v36 }
 0x1bf   :  { %v532_v50 = vpop.eup %531  ;;  %v362_v51 = vadd.f32 %v342_v47, %v306_v33  ;;  %v345_v52 = vmul.f32 0.6931472, %v530_v44 }
 0x1c0   :  { %v333_v54 = vsel %vm332_vm9, %v330_v46, %v327_v45  ;;  %v354_v55 = vmul.f32 0.6931472, %v532_v50 }
 0x1c1   :  { %v361_v57 = vadd.f32 %v333_v54, %v305_v42  ;;  %v391_v58 = vmul.f32 %v378_v21, %v362_v51  ;;  %v427_v59 = vmul.f32 %v416_v26, %v362_v51  ;;  %v351_v60 = vsel %vm350_vm10, %v348_v53, %v345_v52 }
 0x1c2   :  { %v363_v61 = vadd.f32 %v351_v60, %v307_v43  ;;  %v360_v62 = vsel %vm359_vm11, %v357_v56, %v354_v55 }
 0x1c3   :  { %v390_v63 = vmul.f32 %v373_v20, %v361_v57  ;;  %v426_v0 = vmul.f32 %v412_v25, %v361_v57  ;;  %v364_v1 = vadd.f32 %v360_v62, %v308_v41 }
 0x1c4   :  { %v428_v2 = vmul.f32 %v420_v48, %v363_v61  ;;  %v392_v3 = vmul.f32 %v383_v49, %v363_v61 }
 0x1c5   :  { %v430_v6 = vadd.f32 %v427_v59, %v426_v0  ;;  %v394_v7 = vadd.f32 %v391_v58, %v390_v63  ;;  %v429_v8 = vmul.f32 %v424_v4, %v364_v1  ;;  %v393_v9 = vmul.f32 %v388_v5, %v364_v1 }
 0x1c7   :  { %v431_v10 = vadd.f32 %v430_v6, %v428_v2  ;;  %v395_v11 = vadd.f32 %v394_v7, %v392_v3  ;;  %v432_v12 = vsel %vm216_vm4, %v429_v8, 0.0  ;;  %v396_v13 = vsel %vm216_vm4, %v393_v9, 0.0 }
 0x1c9   :  { %v433_v14 = vadd.f32 %v432_v12, %v431_v10  ;;  %v397_v15 = vadd.f32 %v396_v13, %v395_v11 }
 0x1cb   :  { %v434_v16 = vrot.slane %v433_v14, 4  ;;  %v398_v17 = vrot.slane %v397_v15, 4 }
 0x1cd   :  { %v435_v18 = vadd.f32 %v434_v16, %v433_v14  ;;  %v399_v19 = vadd.f32 %v398_v17, %v397_v15 }
 0x1cf   :  { %v400_v20 = vrot.slane %v399_v19, 2  ;;  %v436_v21 = vrot.slane %v435_v18, 2 }
 0x1d1   :  { %v401_v22 = vadd.f32 %v400_v20, %v399_v19  ;;  %v437_v23 = vadd.f32 %v436_v21, %v435_v18 }
 0x1d3   :  { %v402_v24 = vrot.slane %v401_v22, 1  ;;  %v438_v25 = vrot.slane %v437_v23, 1 }
 0x1d5   :  { %v403_v26 = vadd.f32 %v402_v24, %v401_v22  ;;  %v439_v27 = vadd.f32 %v438_v25, %v437_v23 }
 0x1d7   :  { %v409_v29 = vadd.f32 %v407_v28, %v403_v26  ;;  %v440_v30 = vadd.f32 %v439_v27, %v407_v28 }
 0x1d9   :  { %v442_v31 = vsel %vm441_vm12, %v409_v29, %v440_v30 }
 0x1da   :  { %443 = vst [vmem:[%s687_s7] sm:$0x3] %v442_v31 }

</bundles_post_ra>
